<compile_context>
chip_gen: v6e
topology: v6e:2x2x1
jax: 0.10.0
libtpu: 0.0.40
codegen_flags: <defaults>
</compile_context>

<pallas_src>
import functools

import jax
import jax.numpy as jnp
from jax.experimental import pallas as pl
from jax.experimental.pallas import tpu as pltpu

_MiB = 1024 * 1024


def _vmem_budgets():
    """Generation-aware (block-sizing budget, vmem_limit_bytes), both in bytes.

    v5e/v6e have 128 MiB VMEM per TensorCore; v7x has 64 MiB.  Falls back to the
    conservative (v7x-like) numbers if the hardware query is unavailable.
    """
    try:
        cap = int(pltpu.get_tpu_info().vmem_capacity_bytes)
    except Exception:
        cap = 64 * _MiB
    if cap >= 128 * _MiB:            # v5e / v6e
        return 48 * _MiB, 96 * _MiB
    return 28 * _MiB, 56 * _MiB      # v7x (64 MiB per TensorCore)


# ---------------------------------------------------------------------------
# Primary path: full cat([prefix, ctx, suffix]) semantics.
# ---------------------------------------------------------------------------

def _prompt_kernel(prefix_ref, ctx_ref, suffix_ref, out_ref, *, n_ctx):
    # prefix_ref: (C, 1, D)      per-class SOS embeddings for this class block
    # ctx_ref:    (n_ctx, D)     shared learnable context (resident across the grid)
    # suffix_ref: (C, S_suf, D)  per-class classname + EOS embeddings
    # out_ref:    (C, 1 + n_ctx + S_suf, D)
    c, _, d = out_ref.shape

    # Region 1: SOS prefix.
    out_ref[:, 0:1, :] = prefix_ref[...]

    # Region 2: learnable context, broadcast over the class-block axis.
    # Single broadcast per grid step (JAX does not CSE broadcast_in_dim).
    ctx_b = jnp.broadcast_to(ctx_ref[...][None, :, :], (c, n_ctx, d))
    out_ref[:, 1:1 + n_ctx, :] = ctx_b

    # Region 3: classname + EOS suffix (wrapper guarantees S_suf > 0 here).
    out_ref[:, 1 + n_ctx:, :] = suffix_ref[...]


def _pick_block_c(n_cls, per_class_bytes, ctx_bytes, budget_bytes):
    """Largest class block that fits the double-buffered working set in the VMEM
    budget (no divisibility requirement, no artificial class cap), then split so
    there are >=2 (even when possible) grid blocks for v7x's two TensorCores."""
    usable = max(2 * per_class_bytes, budget_bytes - 2 * ctx_bytes)
    cap = max(1, usable // (2 * per_class_bytes))   # double-buffered per-class set
    cap = int(min(cap, n_cls))
    num_blocks = int(pl.cdiv(n_cls, cap))
    if n_cls >= 2:
        num_blocks = max(num_blocks, 2)             # both v7x TCs get work
        if num_blocks % 2:
            num_blocks += 1
        num_blocks = min(num_blocks, n_cls)         # keep block_c >= 1
    block_c = int(pl.cdiv(n_cls, num_blocks))
    num_blocks = int(pl.cdiv(n_cls, block_c))
    return block_c, num_blocks


def coop_prompt_forward(token_prefix, ctx, token_suffix, *, block_c=None):
    """Pallas implementation of CoOp_PromptLearner.forward().

    token_prefix: (n_cls, 1, D)
    ctx:          (n_ctx, D)
    token_suffix: (n_cls, S_suf, D)
    returns prompts: (n_cls, 1 + n_ctx + S_suf, D)
    """
    n_cls, _, d = token_prefix.shape
    n_ctx = ctx.shape[0]
    s_suf = token_suffix.shape[1]
    seq_len = 1 + n_ctx + s_suf

    # Explicit dtype policy: produce the output in the CLIP embedding dtype
    # (token_prefix's dtype) -- in the torch module ctx is created with
    # clip_model.dtype, so everything already matches; casting ctx down (rather
    # than result_type promotion) avoids silently upcasting the whole output.
    out_dtype = token_prefix.dtype
    ctx = ctx.astype(out_dtype)
    token_suffix = token_suffix.astype(out_dtype)

    # Degenerate shapes that would need 0-sized block dims: plain jnp fallback.
    if n_cls == 0 or n_ctx == 0 or s_suf == 0:
        return jnp.concatenate(
            [token_prefix,
             jnp.broadcast_to(ctx[None], (n_cls, n_ctx, d)),
             token_suffix], axis=1)

    itemsize = jnp.dtype(out_dtype).itemsize
    budget_bytes, vmem_limit = _vmem_budgets()
    # Per class: prefix row + suffix rows (in) + full prompt row (out).
    per_class_bytes = (1 + s_suf + seq_len) * d * itemsize
    ctx_bytes = n_ctx * d * itemsize

    if block_c is None:
        block_c, num_blocks = _pick_block_c(n_cls, per_class_bytes, ctx_bytes,
                                            budget_bytes)
    else:  # explicit override (used in tests to exercise the partial-block path)
        block_c = int(min(block_c, n_cls))
        num_blocks = int(pl.cdiv(n_cls, block_c))

    total_bytes = (token_prefix.size + ctx.size + token_suffix.size
                   + n_cls * seq_len * d) * itemsize

    kernel = functools.partial(_prompt_kernel, n_ctx=n_ctx)

    return pl.pallas_call(
        kernel,
        out_shape=jax.ShapeDtypeStruct((n_cls, seq_len, d), out_dtype),
        grid=(num_blocks,),
        in_specs=[
            # Per-class-block prefix. Last two block dims equal the full array
            # dims, so no (8,128) divisibility issue even for small D.
            pl.BlockSpec((block_c, 1, d), lambda i: (i, 0, 0)),
            # Shared ctx: constant index_map -> stays resident across the grid.
            pl.BlockSpec((n_ctx, d), lambda i: (0, 0)),
            # Per-class-block suffix.
            pl.BlockSpec((block_c, s_suf, d), lambda i: (i, 0, 0)),
        ],
        out_specs=pl.BlockSpec((block_c, seq_len, d), lambda i: (i, 0, 0)),
        compiler_params=pltpu.CompilerParams(
            # Class-block axis is embarrassingly parallel: shards across the two
            # TensorCores on v7x, no-op on single-TC v5e/v6e.
            dimension_semantics=("parallel",),
            # Generation-aware (96 MiB on 128-MiB parts, 56 MiB on v7x).
            vmem_limit_bytes=int(vmem_limit),
        ),
        cost_estimate=pl.CostEstimate(
            flops=0, transcendentals=0, bytes_accessed=int(total_bytes)),
    )(token_prefix, ctx, token_suffix)


# ---------------------------------------------------------------------------
# Template-aliased fast path: write ONLY the ctx slab (prefix/suffix prebuilt).
# ---------------------------------------------------------------------------

def _ctx_writer_kernel(tmpl_ref, ctx_ref, out_ref, slab_ref, sem,
                       *, n_ctx, block_c, rem, num_blocks):
    # tmpl_ref: (n_cls, seq, D) HBM ref, aliased to out_ref's buffer; never read.
    # ctx_ref:  (n_ctx, D)      VMEM, resident across the grid.
    # out_ref:  (n_cls, seq, D) HBM ref == the template buffer.
    # slab_ref: (block_c, n_ctx, D) VMEM scratch holding the broadcast ctx slab.
    del tmpl_ref  # prefix/suffix rows are preserved in place via aliasing.
    i = pl.program_id(0)

    # Tiny broadcast, rebuilt each step so every grid step is self-contained.
    slab_ref[...] = jnp.broadcast_to(ctx_ref[...][None, :, :], slab_ref.shape)

    c0 = i * block_c

    @pl.when(i < num_blocks - 1)
    def _():
        cp = pltpu.make_async_copy(
            slab_ref,
            out_ref.at[pl.ds(c0, block_c), pl.ds(1, n_ctx), :],
            sem)
        cp.start()
        cp.wait()

    @pl.when(i == num_blocks - 1)   # last (possibly partial) class block
    def _():
        cp = pltpu.make_async_copy(
            slab_ref.at[pl.ds(0, rem), :, :],
            out_ref.at[pl.ds(c0, rem), pl.ds(1, n_ctx), :],
            sem)
        cp.start()
        cp.wait()


def coop_prompt_update_ctx(prompts_template, ctx):
    """Fast path: `prompts_template` is a prebuilt (n_cls, seq, D) prompts buffer
    (prefix/suffix already in place, built once at init).  Only
    prompts[:, 1:1+n_ctx, :] is rewritten from `ctx`; the rest is preserved via
    input_output_aliases.  Call under jax.jit(..., donate_argnums=0) so the
    template buffer is updated in place with no copy."""
    n_cls, seq_len, d = prompts_template.shape
    n_ctx = ctx.shape[0]
    assert 1 + n_ctx <= seq_len
    out_dtype = prompts_template.dtype
    ctx = ctx.astype(out_dtype)

    if n_cls == 0 or n_ctx == 0:
        return prompts_template

    itemsize = jnp.dtype(out_dtype).itemsize
    # Keep the broadcast slab small; a few MiB is plenty to amortize DMA setup.
    slab_budget = 4 * _MiB
    block_c = int(max(1, min(n_cls, slab_budget // max(1, n_ctx * d * itemsize))))
    num_blocks = int(pl.cdiv(n_cls, block_c))
    rem = n_cls - (num_blocks - 1) * block_c

    kernel = functools.partial(_ctx_writer_kernel, n_ctx=n_ctx, block_c=block_c,
                               rem=rem, num_blocks=num_blocks)

    bytes_accessed = (ctx.size + n_cls * n_ctx * d) * itemsize

    return pl.pallas_call(
        kernel,
        out_shape=jax.ShapeDtypeStruct((n_cls, seq_len, d), out_dtype),
        grid=(num_blocks,),
        in_specs=[
            pl.BlockSpec(memory_space=pl.ANY),           # template (aliased, HBM)
            pl.BlockSpec((n_ctx, d), lambda i: (0, 0)),  # ctx, resident in VMEM
        ],
        out_specs=pl.BlockSpec(memory_space=pl.ANY),     # written only via DMA
        scratch_shapes=[
            pltpu.VMEM((block_c, n_ctx, d), out_dtype),
            pltpu.SemaphoreType.DMA(()),
        ],
        input_output_aliases={0: 0},
        compiler_params=pltpu.CompilerParams(
            dimension_semantics=("arbitrary",)),
        cost_estimate=pl.CostEstimate(
            flops=0, transcendentals=0, bytes_accessed=int(bytes_accessed)),
    )(prompts_template, ctx)


# ---------------------------------------------------------------------------
# Reference + test harness
# ---------------------------------------------------------------------------

def _reference(token_prefix, ctx, token_suffix):
    n_cls = token_prefix.shape[0]
    n_ctx, d = ctx.shape
    return jnp.concatenate(
        [token_prefix,
         jnp.broadcast_to(ctx[None], (n_cls, n_ctx, d)),
         token_suffix],
        axis=1,
    )


def _make_inputs(key, n_cls, n_ctx, seq_len, ctx_dim, dtype):
    s_suf = seq_len - 1 - n_ctx
    k_pre, k_ctx, k_suf = jax.random.split(key, 3)
    # Deterministic stand-ins for CLIP token embeddings (std ~0.02).
    token_prefix = (0.02 * jax.random.normal(k_pre, (n_cls, 1, ctx_dim))).astype(dtype)
    ctx_vectors = (0.02 * jax.random.normal(k_ctx, (n_ctx, ctx_dim))).astype(dtype)
    token_suffix = (0.02 * jax.random.normal(k_suf, (n_cls, s_suf, ctx_dim))).astype(dtype)
    return token_prefix, ctx_vectors, token_suffix


if __name__ == "__main__":
    key = jax.random.PRNGKey(0)
    dtype = jnp.float32

    # ---- Config 1: tiny toy shapes consistent with the module
    # (n_ctx = len("a photo of a".split()) = 4). ----
    n_cls, n_ctx, seq_len, ctx_dim = 2, 4, 8, 32
    tp, cv, ts = _make_inputs(key, n_cls, n_ctx, seq_len, ctx_dim, dtype)
    prompts = jax.block_until_ready(coop_prompt_forward(tp, cv, ts))
    ref = _reference(tp, cv, ts)
    assert prompts.shape == (n_cls, seq_len, ctx_dim), prompts.shape
    assert prompts.dtype == dtype, prompts.dtype
    assert jnp.array_equal(prompts, ref), "Pallas output mismatch vs reference (cfg 1)"

    # ---- Config 2: lane-dense D, class count NOT a multiple of the block size,
    # exercising the pl.cdiv grid / partial last block path. ----
    key2 = jax.random.fold_in(key, 1)
    n_cls2, n_ctx2, seq_len2, ctx_dim2 = 13, 4, 24, 128
    tp2, cv2, ts2 = _make_inputs(key2, n_cls2, n_ctx2, seq_len2, ctx_dim2, dtype)
    ref2 = _reference(tp2, cv2, ts2)

    # Forced small class block -> 4 blocks, last one partial (1 valid class).
    prompts2 = jax.block_until_ready(coop_prompt_forward(tp2, cv2, ts2, block_c=4))
    assert prompts2.shape == (n_cls2, seq_len2, ctx_dim2), prompts2.shape
    assert jnp.array_equal(prompts2, ref2), "Pallas output mismatch vs reference (cfg 2 forced)"

    # Auto-sized path on the same inputs (VMEM-budget-derived block, >=2 blocks).
    prompts2b = jax.block_until_ready(coop_prompt_forward(tp2, cv2, ts2))
    assert jnp.array_equal(prompts2b, ref2), "Pallas output mismatch vs reference (cfg 2 auto)"

    # ---- Config 3: template-aliased fast path: prebuilt prompts with a stale ctx
    # slab; only prompts[:, 1:1+n_ctx, :] is rewritten, prefix/suffix preserved. ----
    template = _reference(tp2, jnp.zeros_like(cv2), ts2)   # stale ctx region
    update = jax.jit(coop_prompt_update_ctx, donate_argnums=(0,))
    prompts3 = jax.block_until_ready(update(template, cv2))
    assert prompts3.shape == (n_cls2, seq_len2, ctx_dim2), prompts3.shape
    assert jnp.array_equal(prompts3, ref2), "Pallas output mismatch vs reference (cfg 3)"

    print("KERNEL_OK")
</pallas_src>

<mosaic_0001>
module attributes {stable_mosaic.version = 11 : i64} {
  func.func @_prompt_kernel(%arg0: i32, %arg1: memref<1x1x32xf32, #tpu.memory_space<vmem>>, %arg2: memref<4x32xf32, #tpu.memory_space<vmem>>, %arg3: memref<1x3x32xf32, #tpu.memory_space<vmem>>, %arg4: memref<1x8x32xf32, #tpu.memory_space<vmem>>) attributes {dimension_semantics = [#tpu.dimension_semantics<parallel>], iteration_bounds = array<i64: 2>, scalar_prefetch = 0 : i64, scratch_operands = 0 : i64, tpu.core_type = #tpu.core_type<tc>, window_params = [{transform_indices = @transform_0, window_bounds = array<i64: 1, 1, 32>}, {pipeline_mode = #tpu.pipeline_mode<synchronous>, transform_indices = @transform_1, window_bounds = array<i64: 4, 32>}, {transform_indices = @transform_2, window_bounds = array<i64: 1, 3, 32>}, {transform_indices = @transform_3, window_bounds = array<i64: 1, 8, 32>}]} {
    %c0 = arith.constant 0 : index
    %c0_0 = arith.constant 0 : index
    %c0_1 = arith.constant 0 : index
    %0 = vector.load %arg1[%c0, %c0_0, %c0_1] : memref<1x1x32xf32, #tpu.memory_space<vmem>>, vector<1x1x32xf32>
    %c0_2 = arith.constant 0 : index
    %c0_3 = arith.constant 0 : index
    %c0_4 = arith.constant 0 : index
    %1 = vector.load %arg4[%c0_2, %c0_3, %c0_4] : memref<1x8x32xf32, #tpu.memory_space<vmem>>, vector<1x1x32xf32>
    tpu.vector_store %arg4[%c0_2, %c0_3, %c0_4], %0 {strides = array<i32>} : memref<1x8x32xf32, #tpu.memory_space<vmem>>, vector<1x1x32xf32>,
    %c0_5 = arith.constant 0 : index
    %c0_6 = arith.constant 0 : index
    %2 = vector.load %arg2[%c0_5, %c0_6] : memref<4x32xf32, #tpu.memory_space<vmem>>, vector<4x32xf32>
    %3 = vector.shape_cast %2 : vector<4x32xf32> to vector<1x4x32xf32>
    %c0_7 = arith.constant 0 : index
    %c1 = arith.constant 1 : index
    %c0_8 = arith.constant 0 : index
    %4 = vector.load %arg4[%c0_7, %c1, %c0_8] : memref<1x8x32xf32, #tpu.memory_space<vmem>>, vector<1x4x32xf32>
    tpu.vector_store %arg4[%c0_7, %c1, %c0_8], %3 {strides = array<i32>} : memref<1x8x32xf32, #tpu.memory_space<vmem>>, vector<1x4x32xf32>,
    %c0_9 = arith.constant 0 : index
    %c0_10 = arith.constant 0 : index
    %c0_11 = arith.constant 0 : index
    %5 = vector.load %arg3[%c0_9, %c0_10, %c0_11] : memref<1x3x32xf32, #tpu.memory_space<vmem>>, vector<1x3x32xf32>
    %c0_12 = arith.constant 0 : index
    %c5 = arith.constant 5 : index
    %c0_13 = arith.constant 0 : index
    %6 = vector.load %arg4[%c0_12, %c5, %c0_13] : memref<1x8x32xf32, #tpu.memory_space<vmem>>, vector<1x3x32xf32>
    tpu.vector_store %arg4[%c0_12, %c5, %c0_13], %5 {strides = array<i32>} : memref<1x8x32xf32, #tpu.memory_space<vmem>>, vector<1x3x32xf32>,
    return
  }
  func.func @transform_0(%arg0: i32) -> (i32, i32, i32) {
    %c0_i32 = arith.constant 0 : i32
    %c0_i32_0 = arith.constant 0 : i32
    %c0_i32_1 = arith.constant 0 : i32
    return %arg0, %c0_i32, %c0_i32_0 : i32, i32, i32
  }
  func.func @transform_1(%arg0: i32) -> (i32, i32) {
    %c0_i32 = arith.constant 0 : i32
    %c0_i32_0 = arith.constant 0 : i32
    %c0_i32_1 = arith.constant 0 : i32
    return %c0_i32, %c0_i32_0 : i32, i32
  }
  func.func @transform_2(%arg0: i32) -> (i32, i32, i32) {
    %c0_i32 = arith.constant 0 : i32
    %c0_i32_0 = arith.constant 0 : i32
    %c0_i32_1 = arith.constant 0 : i32
    return %arg0, %c0_i32, %c0_i32_0 : i32, i32, i32
  }
  func.func @transform_3(%arg0: i32) -> (i32, i32, i32) {
    %c0_i32 = arith.constant 0 : i32
    %c0_i32_0 = arith.constant 0 : i32
    %c0_i32_1 = arith.constant 0 : i32
    return %arg0, %c0_i32, %c0_i32_0 : i32, i32, i32
  }
}

</mosaic_0001>

<bundles_post_ra>
// kernel: tpu_custom_call.1
= control target key start
LH: loop header
LB: loop body
LE: loop exit
PB: predicated region body
PF: predicated region fallthrough
CT: control target
= control target key end

     0   :  { %8 = vsyncpa [#allocation3], 0  ;;  %s508_s0 = inlined_call_operand.vmem [shape: f32[2,1,32], index: 0, kind: input, shape index: {}]   ;;  %s509_s1 = inlined_call_operand.vmem [shape: f32[4,32], index: 1, kind: input, shape index: {}]   ;;  %s510_s2 = inlined_call_operand.vmem [shape: f32[2,3,32], index: 2, kind: input, shape index: {}]   ;;  %s511_s3 = inlined_call_operand.hbm [shape: f32[2,8,32], index: 3, kind: output, shape index: {}]  }
   0x1   :  { %10 = vsyncpa [#allocation3 + $0x1], 0  ;;  %s403_s12 = smov 0   ;;  %s405_s13 = smov 0  }
   0x2   :  { %s407_s14 = smov 0   ;;  %s409_s15 = smov 0  }
   0x3 LB: > { %s424_s16 = sadd.s32 4294967295, %s380_s15   ;;  %s271_s17 = sadd.s32 4294967294, %s380_s15   ;;  %s380_s15 = sphi %s409_s15, %s517_s15   ;;  %s376_s14 = sphi %s407_s14, %s516_s14   ;;  %s372_s13 = sphi %s405_s13, %s515_s13   ;;  %s368_s12 = sphi %s403_s12, %s514_s12  }
   0x4   : > { %s428_s18 = sadd.s32 1, %s380_s15   ;;  %s96_s19 = sadd.s32 1, %s376_s14 }
   0x5   : > { %s93_s20 = ssub.s32 %s380_s15, %s428_s18  ;;  %p106_p0 = scmp.ne.s32.totalorder %s376_s14, %s372_s13 }
   0x6   : > { %p94_p1 = scmp.eq.s32.totalorder %s93_s20, 0  ;;  %p107_p2 = scmp.eq.s32.totalorder %s424_s16, 1 }
   0x7   : > { %p112_p3 = scmp.ne.s32.totalorder %s372_s13, %s368_s12  ;;  %p113_p4 = scmp.eq.s32.totalorder %s271_s17, 1 }
   0x8   : > { %s439_s21 = scalar_select %p94_p1, %s376_s14, %s96_s19  }
   0x9   : > { %p441_p5 = por %p107_p2, %p106_p0  ;;  %p445_p6 = por %p113_p4, %p112_p3 }
   0xa   : > { %p274_p7 = scmp.ge.s32.totalorder %s380_s15, 1  ;;  %p147_p8 = scmp.lt.s32.totalorder %s380_s15, 3 }
   0xc   : > { %p148_p9 = pnand %p274_p7, %p147_p8 }
   0xd   : > { %s170_s24 = sand.u32 (!%p148_p9), 1, %s372_s13   ;;  %p173_p10 = scmp.lt.s32.totalorder (!%p148_p9), %s424_s16, 1 }
   0xe   : > { %151 = sbr.rel (%p148_p9) target bundleno = 42 (0x2a), region = 32  ;;  %s275_s27 = sshll.u32 (!%p148_p9), %s170_s24, 3 }
   0xf   : > { %s278_s28 = sshll.u32 (!%p148_p9), %s424_s16, 7  ;;  %s172_s29 = scalar_lea.vmem (!%p148_p9), [#allocation2], %s275_s27 }
  0x10   : > { %s203_s30 = sshll.u32 (!%p148_p9), %s172_s29, 4  ;;  %s464_s10 = scalar_lea.hbm (!%p148_p9), %s511_s3, %s278_s28  ;;  %s466_s30 = int_to_ptr.vmem [resolvable:$true] %s203_s30 }
  0x11   : > { %s190_s20 = scalar_lea.sflag (!%p148_p9), [#allocation3], %s170_s24  ;;  %s382_s25 = smov (!%p148_p9), [#allocation2]  }
  0x12   : > { %s324_s26 = sshll.u32 (!%p148_p9), %s382_s25, 4  ;;  %s325_s26 = int_to_ptr.vmem [resolvable:$false] %s324_s26 }
  0x13   : > { %v183_v0 = vld [vmem:[%s509_s1] sm:$0xf]  ;;  %vm184_vm0 = vcmask 257024   ;;  %s519_s16 = smov (!%p173_p10, %s424_s16), 1  ;;  %vm181_vm1 = vcmask 253952   ;;  %vm187_vm2 = vcmask 256000   ;;  %p327_p0 = scmp.lt.s32.totalorder %s466_s30, %s325_s26 }
  0x14   : > { %185 = vst.msk [vmem:[%s172_s29 + $0x1] sm:$0xf] %vm184_vm0, %v183_v0  ;;  %s175_s6 = scalar_lea.vmem %s508_s0, %s519_s16  ;;  %s276_s7 = sshll.u32 %s519_s16, 2 }
  0x15   : > { %v180_v1 = vld [vmem:[%s175_s6] sm:$0x1]  ;;  %s179_s19 = scalar_lea.vmem %s510_s2, %s276_s7  ;;  %s320_s16 = scalar_lea.vmem %s466_s30, 128 }
  0x16   : > { %182 = vst.msk [vmem:[%s172_s29] sm:$0x1] %vm181_vm1, %v180_v1  ;;  %v186_v2 = vld [vmem:[%s179_s19] sm:$0x7]  ;;  %p321_p11 = scmp.ne.s32.totalorder %s466_s30, %s320_s16  ;;  %s326_s27 = scalar_lea.vmem %s325_s26, 256 }
  0x17   : > { %188 = vst.msk [vmem:[%s172_s29 + $0x5] sm:$0x7] %vm187_vm2, %v186_v2  ;;  %p328_p1 = scmp.lt.s32.totalorder %s326_s27, %s320_s16 }
  0x18   : > { %p322_p12 = pnand %p321_p11, %p441_p5 }
  0x19   : > { %p329_p2 = por %p328_p1, %p327_p0 }
  0x1a   : > { %p323_p13 = pneg %p322_p12 }
  0x1c   : > { %p330_p3 = pnand %p329_p2, %p323_p13 }
  0x1e   : > { %333 = shalt.err (!%p330_p3)
}
  0x1f   : > { %s334_s28 = scalar_lea.hbm %s464_s10, 128  ;;  %s338_s4 = scalar_lea.hbm %s511_s3, 256 }
  0x20   : > { %p335_p4 = scmp.ne.s32.totalorder %s464_s10, %s334_s28  ;;  %p339_p9 = scmp.lt.s32.totalorder %s464_s10, %s511_s3 }
  0x21   : > { %p340_p10 = scmp.lt.s32.totalorder %s338_s4, %s334_s28 }
  0x22   : > { %p336_p7 = pnand %p335_p4, %p441_p5 }
  0x23   : > { %p341_p11 = por %p340_p10, %p339_p9 }
  0x24   : > { %p337_p8 = pneg %p336_p7 }
  0x26   : > { %p342_p12 = pnand %p341_p11, %p337_p8 }
  0x28   : > { %345 = shalt.err (!%p342_p12)
}
  0x29   : > { %281 = dma.vmem_to_hbm [thread:$0]  (%p441_p5), %s466_s30, 128, %s464_s10, %s190_s20  }
  0x2a PF: > { %p287_p13 = scmp.ge.s32.totalorder %s380_s15, 2  ;;  %s215_s7 = sand.u32 1, %s368_s12  }
  0x2b   : > { %s216_s8 = scalar_lea.sflag [#allocation3], %s215_s7 }
  0x2c   : > { %p284_p0 = pnand %p287_p13, %p445_p6 }
  0x2e   : > { %p285_p1 = pneg %p284_p0 }
  0x30   : > { %363 = dma.done.wait (%p285_p1), %s216_s8, 128  }
  0x31   : > { %365 = vsyncadd (%p285_p1), %s216_s8, 4294967168  ;;  %p13_p2 = scmp.ge.s32.totalorder %s428_s18, 4   ;;  %s514_s12 = smov %s372_s13 }
  0x32   : > { %s515_s13 = smov %s376_s14  ;;  %s516_s14 = smov %s439_s21 }
  0x33   : > { %s517_s15 = smov %s428_s18  ;;  %15 = sbr.rel (!%p13_p2) target bundleno = 3 (0x3), region = 70 }
  0x38   :  { %221 = vsyncpa [#allocation3], 1 }
  0x39   :  { %223 = vsyncpa [#allocation3 + $0x1], 1 }

</bundles_post_ra>
